<compile_context>
chip_gen: v5e
topology: v5e:2x2
jax: 0.10.0
libtpu: 0.0.40
codegen_flags: <defaults>
</compile_context>

<pallas_src>
import functools

import jax
import jax.numpy as jnp
from jax.experimental import pallas as pl
from jax.experimental.pallas import tpu as pltpu


def residual_block_kernel(x_ref, m_ref, w1_ref, b1_ref, w2_ref, b2_ref, o_ref,
                          *, W, slope):
    # x_ref : (nb, Cp, HW)  f32  input block (also the residual identity)
    # m_ref : (9, 1, HW)    f32  precomputed zero-padding masks (per tap)
    # w*_ref: (Cp, 9*Cp)    bf16 conv weights reshaped for fused im2col matmul
    # b*_ref: (Cp, 1)       f32  biases (broadcast over lanes)
    # o_ref : (nb, Cp, HW)  f32  output block (lane-dense trailing dim)
    nb, Cp, HW = x_ref.shape

    x = x_ref[...]                                # (nb, Cp, HW) f32
    masks = [m_ref[t] for t in range(9)]          # 9 x (1, HW) f32, hoisted
    shifts = tuple((i - 1) * W + (j - 1) for i in range(3) for j in range(3))

    def im2col(img):
        # img: (Cp, HW) f32 -> (9*Cp, HW) f32; tap-major rows matching the
        # (Cout, 3, 3, Cin)->(Cout, 9*Cin) weight reshape in the wrapper.
        taps = []
        for t, s in enumerate(shifts):
            if s == 0:
                shifted = img
            else:
                # shifted[p] = img[(p + s) mod HW]; wrapped entries are exactly
                # the positions zeroed by the mask (zero padding).
                shifted = pltpu.roll(img, shift=(-s) % HW, axis=1)
            taps.append(shifted * masks[t])
        return jnp.concatenate(taps, axis=0)      # (8,128)-aligned chunks

    def conv_lrelu(imgs, w, b):
        # imgs: list of nb (Cp, HW) f32 images.  One fused MXU matmul with
        # K = 9*Cp and N = nb*HW lanes; bf16 operands, f32 accumulation.
        p = jnp.concatenate([im2col(img) for img in imgs], axis=1)  # (9Cp, nb*HW)
        h = jnp.dot(w, p.astype(w.dtype),
                    preferred_element_type=jnp.float32) + b         # (Cp, nb*HW)
        return jnp.where(h > 0, h, slope * h)                       # f32

    # conv1 + LeakyReLU
    h1 = conv_lrelu([x[b] for b in range(nb)], w1_ref[...], b1_ref[...])
    # conv2 + LeakyReLU (per-image lane slices of h1, statically aligned)
    h2 = conv_lrelu([h1[:, b * HW:(b + 1) * HW] for b in range(nb)],
                    w2_ref[...], b2_ref[...])
    # residual add, per-image stores into the output block
    for b in range(nb):
        o_ref[b] = (h2[:, b * HW:(b + 1) * HW] + x[b]).astype(o_ref.dtype)


def _pack_weight(w, c_pad, dtype):
    # PyTorch layout (Cout, Cin, 3, 3) -> (Cp, 9*Cp), tap-major, zero-padded.
    cout, cin, kh, kw = w.shape
    wt = jnp.transpose(w, (0, 2, 3, 1))                          # (Cout,3,3,Cin)
    wt = jnp.pad(wt, ((0, c_pad - cout), (0, 0), (0, 0), (0, c_pad - cin)))
    return wt.reshape(c_pad, kh * kw * c_pad).astype(dtype)


def _border_masks(H, W, dtype=jnp.float32):
    hw = H * W
    hh = jnp.arange(hw) // W
    ww = jnp.arange(hw) % W
    rows = []
    for i in range(3):
        for j in range(3):
            dy, dx = i - 1, j - 1
            valid = ((hh + dy >= 0) & (hh + dy < H) &
                     (ww + dx >= 0) & (ww + dx < W))
            rows.append(valid)
    return jnp.stack(rows).astype(dtype).reshape(9, 1, hw)


def residual_block(x_nchw, w1, b1, w2, b2, slope=0.01, nb=None,
                   mxu_dtype=jnp.bfloat16):
    """w1, w2 are PyTorch-layout conv weights: (Cout, Cin, 3, 3)."""
    N, C, H, W = x_nchw.shape
    Cout = w1.shape[0]
    assert C == Cout, "residual add requires in_ch == out_ch"
    HW = H * W
    Cp = -(-C // 8) * 8                       # channels padded to 8 sublanes

    # --- pick images per grid step (nb) from a conservative VMEM budget ---
    if nb is None:
        itm = jnp.dtype(mxu_dtype).itemsize
        per_img = (Cp * HW * 4) * 4                    # dbl-buffered in + out
        per_img += 9 * Cp * HW * (4 + itm)             # f32 + bf16 im2col taps
        per_img += 3 * Cp * HW * 4                     # h1 / h2 / temporaries
        budget = 8 * 1024 * 1024                       # safe on v5e/v6e/v7x
        nb = max(1, budget // per_img)
        if N >= 2:
            nb = min(nb, -(-N // 2))   # keep >= 2 grid steps (v7x: 2 TCs/chip)
        nb = min(nb, N)
    steps = -(-N // nb)
    Np = steps * nb

    # Inputs: flatten H*W onto the lane axis; zero-pad batch + channels.
    x_flat = x_nchw.reshape(N, C, HW).astype(jnp.float32)
    x_pad = jnp.pad(x_flat, ((0, Np - N), (0, Cp - C), (0, 0)))

    w1_mat = _pack_weight(w1.astype(jnp.float32), Cp, mxu_dtype)
    w2_mat = _pack_weight(w2.astype(jnp.float32), Cp, mxu_dtype)
    b1_col = jnp.pad(b1.astype(jnp.float32), (0, Cp - Cout)).reshape(Cp, 1)
    b2_col = jnp.pad(b2.astype(jnp.float32), (0, Cp - Cout)).reshape(Cp, 1)
    masks = _border_masks(H, W)

    kernel = functools.partial(residual_block_kernel, W=W, slope=slope)

    flops = 4 * Cp * 9 * Cp * HW * Np                  # 2 convs * 2*M*K*N
    bytes_accessed = (2 * Np * Cp * HW * 4 + 9 * HW * 4 +
                      2 * Cp * 9 * Cp * jnp.dtype(mxu_dtype).itemsize +
                      2 * Cp * 4)

    out_flat = pl.pallas_call(
        kernel,
        out_shape=jax.ShapeDtypeStruct((Np, Cp, HW), jnp.float32),
        grid=(steps,),
        in_specs=[
            pl.BlockSpec((nb, Cp, HW), lambda n: (n, 0, 0)),
            pl.BlockSpec((9, 1, HW), lambda n: (0, 0, 0)),
            pl.BlockSpec((Cp, 9 * Cp), lambda n: (0, 0)),
            pl.BlockSpec((Cp, 1), lambda n: (0, 0)),
            pl.BlockSpec((Cp, 9 * Cp), lambda n: (0, 0)),
            pl.BlockSpec((Cp, 1), lambda n: (0, 0)),
        ],
        out_specs=pl.BlockSpec((nb, Cp, HW), lambda n: (n, 0, 0)),
        compiler_params=pltpu.CompilerParams(
            dimension_semantics=("parallel",),
            vmem_limit_bytes=32 * 1024 * 1024),
        cost_estimate=pl.CostEstimate(
            flops=flops, transcendentals=0, bytes_accessed=bytes_accessed),
    )(x_pad, masks, w1_mat, b1_col, w2_mat, b2_col)

    # Drop batch / channel padding; already NCHW.
    return out_flat[:N, :C].reshape(N, C, H, W)


def reference_forward(x_nchw, w1, b1, w2, b2, slope=0.01):
    """Plain-JAX f32 reference matching the PyTorch module semantics."""
    def conv(x, w, b):
        y = jax.lax.conv_general_dilated(
            x, w, window_strides=(1, 1), padding=((1, 1), (1, 1)),
            dimension_numbers=("NCHW", "OIHW", "NCHW"),
            precision=jax.lax.Precision.HIGHEST)
        return y + b.reshape(1, -1, 1, 1)

    out = conv(x_nchw, w1, b1)
    out = jnp.where(out > 0, out, slope * out)
    out = conv(out, w2, b2)
    out = jnp.where(out > 0, out, slope * out)
    return out + x_nchw


if __name__ == "__main__":
    key = jax.random.PRNGKey(0)
    N, C, H, W = 2, 4, 16, 16          # in_ch == out_ch == 4
    k_x, k_w1, k_b1, k_w2, k_b2 = jax.random.split(key, 5)

    x = jax.random.normal(k_x, (N, C, H, W), dtype=jnp.float32)
    # PyTorch conv weight layout: (Cout, Cin, kh, kw)
    w1 = 0.1 * jax.random.normal(k_w1, (C, C, 3, 3), dtype=jnp.float32)
    b1 = 0.1 * jax.random.normal(k_b1, (C,), dtype=jnp.float32)
    w2 = 0.1 * jax.random.normal(k_w2, (C, C, 3, 3), dtype=jnp.float32)
    b2 = 0.1 * jax.random.normal(k_b2, (C,), dtype=jnp.float32)

    out = residual_block(x, w1, b1, w2, b2, slope=0.01)
    out = jax.block_until_ready(out)

    ref = jax.block_until_ready(reference_forward(x, w1, b1, w2, b2, slope=0.01))
    assert out.shape == (N, C, H, W)
    # bf16 MXU operands (per perf review) -> slightly looser tolerance than the
    # f32 HIGHEST-precision reference; accumulation and elementwise math stay f32.
    assert jnp.allclose(out, ref, atol=2e-2, rtol=2e-2), \
        f"max abs err {jnp.max(jnp.abs(out - ref))}"

    print("KERNEL_OK")
</pallas_src>

<mosaic_0001>
module attributes {stable_mosaic.version = 11 : i64} {
  func.func @residual_block_kernel(%arg0: i32, %arg1: memref<1x8x256xf32, #tpu.memory_space<vmem>>, %arg2: memref<9x1x256xf32, #tpu.memory_space<vmem>>, %arg3: memref<8x72xbf16, #tpu.memory_space<vmem>>, %arg4: memref<8x1xf32, #tpu.memory_space<vmem>>, %arg5: memref<8x72xbf16, #tpu.memory_space<vmem>>, %arg6: memref<8x1xf32, #tpu.memory_space<vmem>>, %arg7: memref<1x8x256xf32, #tpu.memory_space<vmem>>) attributes {dimension_semantics = [#tpu.dimension_semantics<parallel>], iteration_bounds = array<i64: 2>, scalar_prefetch = 0 : i64, scratch_operands = 0 : i64, tpu.core_type = #tpu.core_type<tc>, window_params = [{transform_indices = @transform_0, window_bounds = array<i64: 1, 8, 256>}, {pipeline_mode = #tpu.pipeline_mode<synchronous>, transform_indices = @transform_1, window_bounds = array<i64: 9, 1, 256>}, {pipeline_mode = #tpu.pipeline_mode<synchronous>, transform_indices = @transform_2, window_bounds = array<i64: 8, 72>}, {pipeline_mode = #tpu.pipeline_mode<synchronous>, transform_indices = @transform_3, window_bounds = array<i64: 8, 1>}, {pipeline_mode = #tpu.pipeline_mode<synchronous>, transform_indices = @transform_4, window_bounds = array<i64: 8, 72>}, {pipeline_mode = #tpu.pipeline_mode<synchronous>, transform_indices = @transform_5, window_bounds = array<i64: 8, 1>}, {transform_indices = @transform_6, window_bounds = array<i64: 1, 8, 256>}]} {
    %c0 = arith.constant 0 : index
    %c0_0 = arith.constant 0 : index
    %c0_1 = arith.constant 0 : index
    %0 = vector.load %arg1[%c0, %c0_0, %c0_1] : memref<1x8x256xf32, #tpu.memory_space<vmem>>, vector<1x8x256xf32>
    %c0_2 = arith.constant 0 : index
    %c0_3 = arith.constant 0 : index
    %c0_4 = arith.constant 0 : index
    %1 = vector.load %arg2[%c0_2, %c0_3, %c0_4] : memref<9x1x256xf32, #tpu.memory_space<vmem>>, vector<1x1x256xf32>
    %2 = vector.shape_cast %1 : vector<1x1x256xf32> to vector<1x256xf32>
    %c1 = arith.constant 1 : index
    %c0_5 = arith.constant 0 : index
    %c0_6 = arith.constant 0 : index
    %3 = vector.load %arg2[%c1, %c0_5, %c0_6] : memref<9x1x256xf32, #tpu.memory_space<vmem>>, vector<1x1x256xf32>
    %4 = vector.shape_cast %3 : vector<1x1x256xf32> to vector<1x256xf32>
    %c2 = arith.constant 2 : index
    %c0_7 = arith.constant 0 : index
    %c0_8 = arith.constant 0 : index
    %5 = vector.load %arg2[%c2, %c0_7, %c0_8] : memref<9x1x256xf32, #tpu.memory_space<vmem>>, vector<1x1x256xf32>
    %6 = vector.shape_cast %5 : vector<1x1x256xf32> to vector<1x256xf32>
    %c3 = arith.constant 3 : index
    %c0_9 = arith.constant 0 : index
    %c0_10 = arith.constant 0 : index
    %7 = vector.load %arg2[%c3, %c0_9, %c0_10] : memref<9x1x256xf32, #tpu.memory_space<vmem>>, vector<1x1x256xf32>
    %8 = vector.shape_cast %7 : vector<1x1x256xf32> to vector<1x256xf32>
    %c4 = arith.constant 4 : index
    %c0_11 = arith.constant 0 : index
    %c0_12 = arith.constant 0 : index
    %9 = vector.load %arg2[%c4, %c0_11, %c0_12] : memref<9x1x256xf32, #tpu.memory_space<vmem>>, vector<1x1x256xf32>
    %10 = vector.shape_cast %9 : vector<1x1x256xf32> to vector<1x256xf32>
    %c5 = arith.constant 5 : index
    %c0_13 = arith.constant 0 : index
    %c0_14 = arith.constant 0 : index
    %11 = vector.load %arg2[%c5, %c0_13, %c0_14] : memref<9x1x256xf32, #tpu.memory_space<vmem>>, vector<1x1x256xf32>
    %12 = vector.shape_cast %11 : vector<1x1x256xf32> to vector<1x256xf32>
    %c6 = arith.constant 6 : index
    %c0_15 = arith.constant 0 : index
    %c0_16 = arith.constant 0 : index
    %13 = vector.load %arg2[%c6, %c0_15, %c0_16] : memref<9x1x256xf32, #tpu.memory_space<vmem>>, vector<1x1x256xf32>
    %14 = vector.shape_cast %13 : vector<1x1x256xf32> to vector<1x256xf32>
    %c7 = arith.constant 7 : index
    %c0_17 = arith.constant 0 : index
    %c0_18 = arith.constant 0 : index
    %15 = vector.load %arg2[%c7, %c0_17, %c0_18] : memref<9x1x256xf32, #tpu.memory_space<vmem>>, vector<1x1x256xf32>
    %16 = vector.shape_cast %15 : vector<1x1x256xf32> to vector<1x256xf32>
    %c8 = arith.constant 8 : index
    %c0_19 = arith.constant 0 : index
    %c0_20 = arith.constant 0 : index
    %17 = vector.load %arg2[%c8, %c0_19, %c0_20] : memref<9x1x256xf32, #tpu.memory_space<vmem>>, vector<1x1x256xf32>
    %18 = vector.shape_cast %17 : vector<1x1x256xf32> to vector<1x256xf32>
    %19 = vector.shape_cast %0 : vector<1x8x256xf32> to vector<8x256xf32>
    %c0_21 = arith.constant 0 : index
    %c0_22 = arith.constant 0 : index
    %20 = vector.load %arg3[%c0_21, %c0_22] : memref<8x72xbf16, #tpu.memory_space<vmem>>, vector<8x72xbf16>
    %c0_23 = arith.constant 0 : index
    %c0_24 = arith.constant 0 : index
    %21 = vector.load %arg4[%c0_23, %c0_24] : memref<8x1xf32, #tpu.memory_space<vmem>>, vector<8x1xf32>
    %c17_i32 = arith.constant 17 : i32
    %22 = tpu.dynamic_rotate %19 by %c17_i32 dim 1 : vector<8x256xf32>, i32 -> vector<8x256xf32>
    %23 = vector.broadcast %2 : vector<1x256xf32> to vector<8x256xf32>
    %24 = arith.mulf %22, %23 : vector<8x256xf32>
    %c16_i32 = arith.constant 16 : i32
    %25 = tpu.dynamic_rotate %19 by %c16_i32 dim 1 : vector<8x256xf32>, i32 -> vector<8x256xf32>
    %26 = vector.broadcast %4 : vector<1x256xf32> to vector<8x256xf32>
    %27 = arith.mulf %25, %26 : vector<8x256xf32>
    %c15_i32 = arith.constant 15 : i32
    %28 = tpu.dynamic_rotate %19 by %c15_i32 dim 1 : vector<8x256xf32>, i32 -> vector<8x256xf32>
    %29 = vector.broadcast %6 : vector<1x256xf32> to vector<8x256xf32>
    %30 = arith.mulf %28, %29 : vector<8x256xf32>
    %c1_i32 = arith.constant 1 : i32
    %31 = tpu.dynamic_rotate %19 by %c1_i32 dim 1 : vector<8x256xf32>, i32 -> vector<8x256xf32>
    %32 = vector.broadcast %8 : vector<1x256xf32> to vector<8x256xf32>
    %33 = arith.mulf %31, %32 : vector<8x256xf32>
    %34 = vector.broadcast %10 : vector<1x256xf32> to vector<8x256xf32>
    %35 = arith.mulf %19, %34 : vector<8x256xf32>
    %c255_i32 = arith.constant 255 : i32
    %36 = tpu.dynamic_rotate %19 by %c255_i32 dim 1 : vector<8x256xf32>, i32 -> vector<8x256xf32>
    %37 = vector.broadcast %12 : vector<1x256xf32> to vector<8x256xf32>
    %38 = arith.mulf %36, %37 : vector<8x256xf32>
    %c241_i32 = arith.constant 241 : i32
    %39 = tpu.dynamic_rotate %19 by %c241_i32 dim 1 : vector<8x256xf32>, i32 -> vector<8x256xf32>
    %40 = vector.broadcast %14 : vector<1x256xf32> to vector<8x256xf32>
    %41 = arith.mulf %39, %40 : vector<8x256xf32>
    %c240_i32 = arith.constant 240 : i32
    %42 = tpu.dynamic_rotate %19 by %c240_i32 dim 1 : vector<8x256xf32>, i32 -> vector<8x256xf32>
    %43 = vector.broadcast %16 : vector<1x256xf32> to vector<8x256xf32>
    %44 = arith.mulf %42, %43 : vector<8x256xf32>
    %c239_i32 = arith.constant 239 : i32
    %45 = tpu.dynamic_rotate %19 by %c239_i32 dim 1 : vector<8x256xf32>, i32 -> vector<8x256xf32>
    %46 = vector.broadcast %18 : vector<1x256xf32> to vector<8x256xf32>
    %47 = arith.mulf %45, %46 : vector<8x256xf32>
    %48 = tpu.concatenate %24, %27, %30, %33, %35, %38, %41, %44, %47 in 0 : vector<8x256xf32>, vector<8x256xf32>, vector<8x256xf32>, vector<8x256xf32>, vector<8x256xf32>, vector<8x256xf32>, vector<8x256xf32>, vector<8x256xf32>, vector<8x256xf32> -> vector<72x256xf32>
    %49 = arith.truncf %48 : vector<72x256xf32> to vector<72x256xbf16>
    %cst = arith.constant dense<0.000000e+00> : vector<8x256xf32>
    %50 = tpu.matmul %20, %49, %cst {dimension_numbers = #tpu.dot_dimension_numbers<[1], [0], [0], [1], [0, 0, 1, 1], [], []>} : vector<8x72xbf16>, vector<72x256xbf16>, vector<8x256xf32> -> vector<8x256xf32>
    %51 = vector.broadcast %21 : vector<8x1xf32> to vector<8x256xf32>
    %52 = arith.addf %50, %51 : vector<8x256xf32>
    %cst_25 = arith.constant 0.000000e+00 : f32
    %53 = vector.broadcast %cst_25 : f32 to vector<8x256xf32>
    %54 = arith.cmpf ogt, %52, %53 : vector<8x256xf32>
    %cst_26 = arith.constant 0.00999999977 : f32
    %55 = vector.broadcast %cst_26 : f32 to vector<8x256xf32>
    %56 = arith.mulf %55, %52 : vector<8x256xf32>
    %57 = arith.select %54, %52, %56 : vector<8x256xi1>, vector<8x256xf32>
    %c0_27 = arith.constant 0 : index
    %c0_28 = arith.constant 0 : index
    %58 = vector.load %arg5[%c0_27, %c0_28] : memref<8x72xbf16, #tpu.memory_space<vmem>>, vector<8x72xbf16>
    %c0_29 = arith.constant 0 : index
    %c0_30 = arith.constant 0 : index
    %59 = vector.load %arg6[%c0_29, %c0_30] : memref<8x1xf32, #tpu.memory_space<vmem>>, vector<8x1xf32>
    %c17_i32_31 = arith.constant 17 : i32
    %60 = tpu.dynamic_rotate %57 by %c17_i32_31 dim 1 : vector<8x256xf32>, i32 -> vector<8x256xf32>
    %61 = vector.broadcast %2 : vector<1x256xf32> to vector<8x256xf32>
    %62 = arith.mulf %60, %61 : vector<8x256xf32>
    %c16_i32_32 = arith.constant 16 : i32
    %63 = tpu.dynamic_rotate %57 by %c16_i32_32 dim 1 : vector<8x256xf32>, i32 -> vector<8x256xf32>
    %64 = vector.broadcast %4 : vector<1x256xf32> to vector<8x256xf32>
    %65 = arith.mulf %63, %64 : vector<8x256xf32>
    %c15_i32_33 = arith.constant 15 : i32
    %66 = tpu.dynamic_rotate %57 by %c15_i32_33 dim 1 : vector<8x256xf32>, i32 -> vector<8x256xf32>
    %67 = vector.broadcast %6 : vector<1x256xf32> to vector<8x256xf32>
    %68 = arith.mulf %66, %67 : vector<8x256xf32>
    %c1_i32_34 = arith.constant 1 : i32
    %69 = tpu.dynamic_rotate %57 by %c1_i32_34 dim 1 : vector<8x256xf32>, i32 -> vector<8x256xf32>
    %70 = vector.broadcast %8 : vector<1x256xf32> to vector<8x256xf32>
    %71 = arith.mulf %69, %70 : vector<8x256xf32>
    %72 = vector.broadcast %10 : vector<1x256xf32> to vector<8x256xf32>
    %73 = arith.mulf %57, %72 : vector<8x256xf32>
    %c255_i32_35 = arith.constant 255 : i32
    %74 = tpu.dynamic_rotate %57 by %c255_i32_35 dim 1 : vector<8x256xf32>, i32 -> vector<8x256xf32>
    %75 = vector.broadcast %12 : vector<1x256xf32> to vector<8x256xf32>
    %76 = arith.mulf %74, %75 : vector<8x256xf32>
    %c241_i32_36 = arith.constant 241 : i32
    %77 = tpu.dynamic_rotate %57 by %c241_i32_36 dim 1 : vector<8x256xf32>, i32 -> vector<8x256xf32>
    %78 = vector.broadcast %14 : vector<1x256xf32> to vector<8x256xf32>
    %79 = arith.mulf %77, %78 : vector<8x256xf32>
    %c240_i32_37 = arith.constant 240 : i32
    %80 = tpu.dynamic_rotate %57 by %c240_i32_37 dim 1 : vector<8x256xf32>, i32 -> vector<8x256xf32>
    %81 = vector.broadcast %16 : vector<1x256xf32> to vector<8x256xf32>
    %82 = arith.mulf %80, %81 : vector<8x256xf32>
    %c239_i32_38 = arith.constant 239 : i32
    %83 = tpu.dynamic_rotate %57 by %c239_i32_38 dim 1 : vector<8x256xf32>, i32 -> vector<8x256xf32>
    %84 = vector.broadcast %18 : vector<1x256xf32> to vector<8x256xf32>
    %85 = arith.mulf %83, %84 : vector<8x256xf32>
    %86 = tpu.concatenate %62, %65, %68, %71, %73, %76, %79, %82, %85 in 0 : vector<8x256xf32>, vector<8x256xf32>, vector<8x256xf32>, vector<8x256xf32>, vector<8x256xf32>, vector<8x256xf32>, vector<8x256xf32>, vector<8x256xf32>, vector<8x256xf32> -> vector<72x256xf32>
    %87 = arith.truncf %86 : vector<72x256xf32> to vector<72x256xbf16>
    %cst_39 = arith.constant dense<0.000000e+00> : vector<8x256xf32>
    %88 = tpu.matmul %58, %87, %cst_39 {dimension_numbers = #tpu.dot_dimension_numbers<[1], [0], [0], [1], [0, 0, 1, 1], [], []>} : vector<8x72xbf16>, vector<72x256xbf16>, vector<8x256xf32> -> vector<8x256xf32>
    %89 = vector.broadcast %59 : vector<8x1xf32> to vector<8x256xf32>
    %90 = arith.addf %88, %89 : vector<8x256xf32>
    %cst_40 = arith.constant 0.000000e+00 : f32
    %91 = vector.broadcast %cst_40 : f32 to vector<8x256xf32>
    %92 = arith.cmpf ogt, %90, %91 : vector<8x256xf32>
    %cst_41 = arith.constant 0.00999999977 : f32
    %93 = vector.broadcast %cst_41 : f32 to vector<8x256xf32>
    %94 = arith.mulf %93, %90 : vector<8x256xf32>
    %95 = arith.select %92, %90, %94 : vector<8x256xi1>, vector<8x256xf32>
    %96 = vector.shape_cast %0 : vector<1x8x256xf32> to vector<8x256xf32>
    %97 = arith.addf %95, %96 : vector<8x256xf32>
    %c0_42 = arith.constant 0 : index
    %c0_43 = arith.constant 0 : index
    %c0_44 = arith.constant 0 : index
    %98 = vector.load %arg7[%c0_42, %c0_43, %c0_44] : memref<1x8x256xf32, #tpu.memory_space<vmem>>, vector<1x8x256xf32>
    %99 = vector.shape_cast %98 : vector<1x8x256xf32> to vector<8x256xf32>
    %100 = vector.shape_cast %97 : vector<8x256xf32> to vector<1x8x256xf32>
    tpu.vector_store %arg7[%c0_42, %c0_43, %c0_44], %100 {strides = array<i32>} : memref<1x8x256xf32, #tpu.memory_space<vmem>>, vector<1x8x256xf32>,
    return
  }
  func.func @transform_0(%arg0: i32) -> (i32, i32, i32) {
    %c0_i32 = arith.constant 0 : i32
    %c0_i32_0 = arith.constant 0 : i32
    %c0_i32_1 = arith.constant 0 : i32
    return %arg0, %c0_i32, %c0_i32_0 : i32, i32, i32
  }
  func.func @transform_1(%arg0: i32) -> (i32, i32, i32) {
    %c0_i32 = arith.constant 0 : i32
    %c0_i32_0 = arith.constant 0 : i32
    %c0_i32_1 = arith.constant 0 : i32
    %c0_i32_2 = arith.constant 0 : i32
    return %c0_i32, %c0_i32_0, %c0_i32_1 : i32, i32, i32
  }
  func.func @transform_2(%arg0: i32) -> (i32, i32) {
    %c0_i32 = arith.constant 0 : i32
    %c0_i32_0 = arith.constant 0 : i32
    %c0_i32_1 = arith.constant 0 : i32
    return %c0_i32, %c0_i32_0 : i32, i32
  }
  func.func @transform_3(%arg0: i32) -> (i32, i32) {
    %c0_i32 = arith.constant 0 : i32
    %c0_i32_0 = arith.constant 0 : i32
    %c0_i32_1 = arith.constant 0 : i32
    return %c0_i32, %c0_i32_0 : i32, i32
  }
  func.func @transform_4(%arg0: i32) -> (i32, i32) {
    %c0_i32 = arith.constant 0 : i32
    %c0_i32_0 = arith.constant 0 : i32
    %c0_i32_1 = arith.constant 0 : i32
    return %c0_i32, %c0_i32_0 : i32, i32
  }
  func.func @transform_5(%arg0: i32) -> (i32, i32) {
    %c0_i32 = arith.constant 0 : i32
    %c0_i32_0 = arith.constant 0 : i32
    %c0_i32_1 = arith.constant 0 : i32
    return %c0_i32, %c0_i32_0 : i32, i32
  }
  func.func @transform_6(%arg0: i32) -> (i32, i32, i32) {
    %c0_i32 = arith.constant 0 : i32
    %c0_i32_0 = arith.constant 0 : i32
    %c0_i32_1 = arith.constant 0 : i32
    return %arg0, %c0_i32, %c0_i32_0 : i32, i32, i32
  }
}

</mosaic_0001>

<bundles_post_ra>
// kernel: tpu_custom_call.1
= control target key start
LH: loop header
LB: loop body
LE: loop exit
PB: predicated region body
PF: predicated region fallthrough
CT: control target
= control target key end

     0   :  { %11 = vsyncpa [#allocation3], 0  ;;  %s1476_s0 = inlined_call_operand.hbm [shape: f32[2,8,256], index: 0, kind: input, shape index: {}]   ;;  %s1477_s1 = inlined_call_operand.vmem [shape: f32[9,1,256], index: 1, kind: input, shape index: {}]   ;;  %s1478_s2 = inlined_call_operand.hbm [shape: bf16[8,72], index: 2, kind: input, shape index: {}]   ;;  %s1479_s3 = inlined_call_operand.vmem [shape: f32[8,1], index: 3, kind: input, shape index: {}]   ;;  %s1480_s4 = inlined_call_operand.hbm [shape: bf16[8,72], index: 4, kind: input, shape index: {}]   ;;  %s1481_s5 = inlined_call_operand.vmem [shape: f32[8,1], index: 5, kind: input, shape index: {}]   ;;  %s1482_s6 = inlined_call_operand.hbm [shape: f32[2,8,256], index: 6, kind: output, shape index: {}]  }
   0x1   :  { %13 = vsyncpa [#allocation3 + $0x1], 0 }
   0x2   :  { %14 = vsyncpa [#allocation6], 0 }
   0x3   :  { %15 = vsyncpa [#allocation4], 0 }
   0x4   :  { %17 = vsyncpa [#allocation4 + $0x1], 0  ;;  %s1052_s21 = smov 0   ;;  %s1054_s22 = smov 0  }
   0x5   :  { %s1056_s23 = smov 0   ;;  %s1058_s24 = smov 0  }
   0x6 LB: > { %s1073_s25 = sadd.s32 4294967295, %s1004_s24   ;;  %s734_s26 = sadd.s32 4294967294, %s1004_s24   ;;  %s1004_s24 = sphi %s1058_s24, %s1494_s24   ;;  %s1000_s23 = sphi %s1056_s23, %s1493_s23   ;;  %s996_s22 = sphi %s1054_s22, %s1492_s22   ;;  %s992_s21 = sphi %s1052_s21, %s1491_s21  }
   0x7   : > { %p43_p0 = scmp.ne.s32.totalorder %s996_s22, %s992_s21  ;;  %p44_p1 = scmp.eq.s32.totalorder %s1073_s25, 0 }
   0x8   : > { %p172_p2 = scmp.eq.s32.totalorder %s1073_s25, 1  ;;  %p178_p3 = scmp.eq.s32.totalorder %s734_s26, 1 }
   0x9   : > { %p1082_p4 = por %p44_p1, %p43_p0  ;;  %p735_p5 = scmp.ge.s32.totalorder %s1004_s24, 1 }
   0xa   : > { %p1087_p6 = por %p178_p3, %p43_p0  ;;  %p185_p7 = scmp.lt.s32.totalorder %s1004_s24, 3 }
   0xb   : > { %s200_s7 = sshll.u32 %s1478_s2, 4  ;;  %s1006_s9 = smov [#allocation5]   ;;  %s201_s7 = int_to_ptr.hbm [resolvable:$true] %s200_s7 }
   0xc   : > { %p1095_p8 = pnand %p735_p5, %p185_p7  ;;  %s202_s10 = sshll.u32 %s1006_s9, 4  ;;  %s203_s10 = int_to_ptr.vmem [resolvable:$true] %s202_s10 }
   0xd   : > { %s215_s13 = sshll.u32 %s1480_s4, 4  ;;  %s1007_s14 = smov [#allocation7]   ;;  %s216_s13 = int_to_ptr.hbm [resolvable:$true] %s215_s13 }
   0xe   : > { %p778_p10 = pneg %p1095_p8  ;;  %s217_s15 = sshll.u32 %s1007_s14, 4  ;;  %s218_s15 = int_to_ptr.vmem [resolvable:$true] %s217_s15 }
   0xf   : > { %s1108_s16 = sadd.s32 1, %s1004_s24   ;;  %s30_s17 = sadd.s32 1, %s1000_s23 }
  0x10   : > { %p779_p11 = pnand %p778_p10, %p44_p1  ;;  %s27_s18 = ssub.s32 %s1004_s24, %s1108_s16 }
  0x11   : > { %p37_p12 = scmp.ne.s32.totalorder %s1000_s23, %s996_s22  ;;  %p28_p13 = scmp.eq.s32.totalorder %s27_s18, 0 }
  0x12   : > { %781 = dma.hbm_to_vmem [thread:$0]  (!%p779_p11), %s201_s7, 64, %s203_s10, [#allocation6]  }
  0x13   : > { %784 = dma.hbm_to_vmem [thread:$0]  (!%p779_p11), %s216_s13, 64, %s218_s15, [#allocation6]  }
  0x14   : > { %p38_p0 = scmp.eq.s32.totalorder %s1004_s24, 0  ;;  %p1118_p3 = por %p172_p2, %p37_p12 }
  0x15   : > { %p795_p5 = scmp.lt.s32.totalorder %s1004_s24, 2  ;;  %s231_s26 = sand.u32 1, %s1000_s23  }
  0x16   : > { %s1124_s20 = scalar_select %p28_p13, %s1000_s23, %s30_s17  }
  0x17   : > { %p39_p7 = por %p38_p0, %p37_p12  ;;  %s739_s29 = sshll.u32 %s231_s26, 4 }
  0x18   : > { %s764_s30 = sshll.u32 %s1004_s24, 4  ;;  %s235_s11 = scalar_lea.vmem [#allocation2], %s739_s29 }
  0x19   : > { %s240_s10 = scalar_lea.hbm %s1476_s0, %s764_s30  ;;  %s244_s12 = sshll.u32 %s235_s11, 4  ;;  %s245_s12 = int_to_ptr.vmem [resolvable:$true] %s244_s12 }
  0x1a   : > { %s242_s13 = sshll.u32 %s240_s10, 4  ;;  %p1131_p2 = pnand %p795_p5, %p39_p7  ;;  %s243_s13 = int_to_ptr.hbm [resolvable:$true] %s242_s13 }
  0x1b   : > { %s232_s15 = scalar_lea.sflag [#allocation3], %s231_s26  ;;  %s904_s17 = sshra.s32 %s243_s13, 4  ;;  %s905_s17 = int_to_ptr.hbm [resolvable:$true] %s904_s17 }
  0x1c   : > { %s906_s18 = scalar_lea.hbm %s905_s17, 16  ;;  %p908_p11 = pneg %p1131_p2 }
  0x1d   : > { %p907_p10 = scmp.ne.s32.totalorder %s905_s17, %s906_s18  ;;  %s911_s7 = scalar_lea.hbm %s1476_s0, 32 }
  0x1e   : > { %p912_p0 = scmp.lt.s32.totalorder %s905_s17, %s1476_s0  ;;  %p913_p5 = scmp.lt.s32.totalorder %s911_s7, %s906_s18 }
  0x1f   : > { %p909_p12 = pnand %p908_p11, %p907_p10 }
  0x20   : > { %p914_p7 = por %p913_p5, %p912_p0 }
  0x21   : > { %p910_p13 = pneg %p909_p12 }
  0x23   : > { %p915_p9 = pnand %p914_p7, %p910_p13 }
  0x25   : > { %918 = shalt.err (!%p915_p9)
}
  0x26   : > { %788 = dma.hbm_to_vmem [thread:$0]  (!%p1131_p2), %s243_s13, 256, %s245_s12, %s232_s15  }
  0x27   : > { %253 = sbr.rel (%p1095_p8) target bundleno = 640 (0x280), region = 44  ;;  %s1148_s26 = sand.u32 (!%p1095_p8), 1, %s996_s22  }
  0x28   : > { %s1483_s11 = sshll.u32 (!%p1095_p8), %s1148_s26, 4  ;;  %s256_s30 = scalar_lea.sflag (!%p1095_p8), [#allocation3], %s1148_s26 }
  0x29   : > { %s259_s17 = scalar_lea.vmem (!%p1095_p8), [#allocation2], %s1483_s11 }
  0x2c   : > { %979 = dma.done.wait (%p1082_p4), %s256_s30, 256  }
  0x2d   : > { %981 = vsyncadd (%p1082_p4), %s256_s30, 4294967040 }
  0x2e   : > { %983 = dma.done.wait (%p44_p1), [#allocation6], 128  }
  0x2f   : > { %985 = vsyncadd (%p44_p1), [#allocation6], 4294967168  ;;  %v1162_v0 = vld [vmem:[%s259_s17] sm:$0xff]  ;;  %s1008_s8 = smov 113   ;;  %s1009_s12 = smov 111   ;;  %v1170_v1 = vld [vmem:[%s259_s17 + $0x8] sm:$0xff]  ;;  %v325_v3 = vlaneseq }
  0x30   : > { %400 = vrot.lane.b32.xlu1 %v1162_v0, %s1008_s8  ;;  %428 = vrot.lane.b32.xlu0 %v1162_v0, %s1009_s12  ;;  %s1010_s13 = smov 112   ;;  %s1011_s27 = smov 127   ;;  %v1203_v8 = vld [vmem:[%s1477_s1 + $0x10] sm:$0x3]  ;;  %v1208_v9 = vld [vmem:[%s1477_s1 + $0xe] sm:$0x3] }
  0x31   : > { %414 = vrot.lane.b32.xlu2 %v1162_v0, %s1010_s13  ;;  %s1012_s14 = smov 15   ;;  %s1013_s15 = smov 1   ;;  %v1198_v6 = vand.u32 127, %v325_v3  ;;  %v1214_v10 = vld [vmem:[%s1477_s1 + $0xc] sm:$0x3]  ;;  %v436_v11 = vperm.slane %v1203_v8, 0 }
  0x32   : > { %s1014_s18 = smov 17   ;;  %s1015_s29 = smov 16   ;;  %v437_v12 = vperm.slane %v1203_v8, 1  ;;  %v422_v13 = vperm.slane %v1208_v9, 0  ;;  %v423_v14 = vperm.slane %v1208_v9, 1  ;;  %v408_v15 = vperm.slane %v1214_v10, 0 }
  0x33   : > { %vm418_vm0 = vcmp.lt.s32.totalorder %v1198_v6, 112  ;;  %vm404_vm1 = vcmp.lt.s32.totalorder %v1198_v6, 113  ;;  %vm432_vm2 = vcmp.lt.s32.totalorder %v1198_v6, 111  ;;  %v409_v16 = vperm.slane %v1214_v10, 1  ;;  %v1227_v19 = vld [vmem:[%s1477_s1 + $0x8] sm:$0x3] }
  0x34   : > { %vm461_vm3 = vcmask 1043456   ;;  %v1248_v28 = vld [vmem:[%s1477_s1 + $0xa] sm:$0x3]  ;;  %v380_v29 = vperm.slane %v1227_v19, 0  ;;  %v381_v30 = vperm.slane %v1227_v19, 1  ;;  %vm390_vm4 = vcmp.lt.s32.totalorder %v1198_v6, 127 }
  0x35   : > { %v394_v40 = vperm.slane %v1248_v28, 0  ;;  %v395_v41 = vperm.slane %v1248_v28, 1  ;;  %v320_v50 = vld [vmem:[%s1479_s3] sm:$0xff]  ;;  %v1016_v54 = vmov 0   ;;  %vm369_vm5 = vcmp.lt.s32.totalorder %v1198_v6, 1 }
  0x36   : > { %v384_v45 = vmul.f32 %v380_v29, %v1162_v0  ;;  %v385_v46 = vmul.f32 %v381_v30, %v1170_v1  ;;  %v1285_v53 = vld [vmem:[%s1477_s1 + $0x6] sm:$0x3]  ;;  %842 = vset.pattern.permute.xlu1 %v1016_v54  ;;  %843 = vset.pattern.permute.xlu0 %v1016_v54  ;;  %v1290_v55 = vld [vmem:[%s1477_s1 + $0x4] sm:$0x3]  ;;  %vm355_vm6 = vcmp.lt.s32.totalorder %v1198_v6, 15  ;;  %vm327_vm7 = vcmp.lt.s32.totalorder %v1198_v6, 17 }
  0x37   : > { %v373_v58 = vperm.slane %v1285_v53, 0  ;;  %v374_v60 = vperm.slane %v1285_v53, 1  ;;  %v359_v61 = vperm.slane %v1290_v55, 0  ;;  %v360_v62 = vperm.slane %v1290_v55, 1 }
  0x38   : > { %402 = vrot.lane.b32.xlu1 %v1170_v1, %s1008_s8  ;;  %430 = vrot.lane.b32.xlu0 %v1170_v1, %s1009_s12  ;;  %vm341_vm8 = vcmp.lt.s32.totalorder %v1198_v6, 16  ;;  %vm457_vm9 = vcmask 588800  }
  0x39   : > { %416 = vrot.lane.b32.xlu2 %v1170_v1, %s1010_s13 }
  0x40   : > { %388 = vrot.lane.b32.xlu1 %v1170_v1, %s1011_s27  ;;  %386 = vrot.lane.b32.xlu0 %v1162_v0, %s1011_s27 }
  0x41   : > { %351 = vrot.lane.b32.xlu2 %v1162_v0, %s1012_s14 }
  0x48   : > { %365 = vrot.lane.b32.xlu1 %v1162_v0, %s1013_s15  ;;  %353 = vrot.lane.b32.xlu0 %v1170_v1, %s1012_s14 }
  0x49   : > { %367 = vrot.lane.b32.xlu2 %v1170_v1, %s1013_s15 }
  0x50   : > { %323 = vrot.lane.b32.xlu1 %v1170_v1, %s1014_s18  ;;  %321 = vrot.lane.b32.xlu0 %v1162_v0, %s1014_s18 }
  0x51   : > { %337 = vrot.lane.b32.xlu2 %v1162_v0, %s1015_s29 }
  0x58   : > { %339 = vrot.lane.b32.xlu0 %v1170_v1, %s1015_s29  ;;  %454 = vperm.xlu1 %842, %v320_v50  }
  0x8b   : > { %v415_v2 = vpop.permute.xlu2 %414 }
  0x93   : > { %v417_v7 = vpop.permute.xlu2 %416 }
  0x94   : > { %v419_v20 = vsel %vm418_vm0, %v415_v2, %v417_v7  ;;  %v420_v24 = vsel %vm418_vm0, %v417_v7, %v415_v2 }
  0x95   : > { %v426_v31 = vmul.f32 %v422_v13, %v419_v20  ;;  %v427_v36 = vmul.f32 %v423_v14, %v420_v24 }
  0x9b   : > { %v352_v35 = vpop.permute.xlu2 %351 }
  0xa2   : > { %v401_v4 = vpop.permute.xlu1 %400  ;;  %v429_v5 = vpop.permute.xlu0 %428 }
  0xa3   : > { %v368_v59 = vpop.permute.xlu2 %367 }
  0xaa   : > { %v403_v17 = vpop.permute.xlu1 %402  ;;  %v431_v18 = vpop.permute.xlu0 %430 }
  0xab   : > { %v405_v21 = vsel %vm404_vm1, %v401_v4, %v403_v17  ;;  %v433_v22 = vsel %vm432_vm2, %v429_v5, %v431_v18  ;;  %v434_v23 = vsel %vm432_vm2, %v431_v18, %v429_v5  ;;  %v406_v25 = vsel %vm404_vm1, %v403_v17, %v401_v4 }
  0xac   : > { %v440_v26 = vmul.f32 %v436_v11, %v433_v22  ;;  %v441_v27 = vmul.f32 %v437_v12, %v434_v23  ;;  %v412_v32 = vmul.f32 %v408_v15, %v405_v21  ;;  %v413_v37 = vmul.f32 %v409_v16, %v406_v25  ;;  %v1317_v25 = vld [vmem:[%s1477_s1] sm:$0x3] }
  0xae   : > { %v450_v33 = vpack.c.bf16 %v440_v26, %v440_v26  ;;  %v451_v34 = vpack.c.bf16 %v441_v27, %v441_v27  ;;  %v448_v44 = vpack.c.bf16 %v426_v31, %v412_v32  ;;  %v449_v49 = vpack.c.bf16 %v427_v36, %v413_v37  ;;  %v1322_v26 = vld [vmem:[%s1477_s1 + $0x2] sm:$0x3] }
  0xaf   : > { %v331_v31 = vperm.slane %v1317_v25, 0  ;;  %v332_v32 = vperm.slane %v1317_v25, 1 }
  0xb0   : > { %v463_v38 = vsel %vm461_vm3, %v450_v33, 0  ;;  %v466_v39 = vsel %vm461_vm3, %v451_v34, 0  ;;  %v338_v33 = vpop.permute.xlu2 %337  ;;  %v345_v34 = vperm.slane %v1322_v26, 0 }
  0xb1   : > { %471 = vmatpush.bf16.msra.mxu0 %v463_v38  ;;  %484 = vmatpush.bf16.msra.mxu1 %v466_v39 }
  0xb2   : > { %v389_v42 = vpop.permute.xlu1 %388  ;;  %v387_v43 = vpop.permute.xlu0 %386 }
  0xb3   : > { %v391_v47 = vsel %vm390_vm4, %v387_v43, %v389_v42  ;;  %v392_v48 = vsel %vm390_vm4, %v389_v42, %v387_v43 }
  0xb4   : > { %v398_v51 = vmul.f32 %v394_v40, %v391_v47  ;;  %v399_v52 = vmul.f32 %v395_v41, %v392_v48 }
  0xb5   : > { %472 = vmatpush.bf16.msra.mxu0 %v448_v44  ;;  %485 = vmatpush.bf16.msra.mxu1 %v449_v49  ;;  %v319_v49 = vld [vmem:[#allocation5] sm:$0xf] }
  0xb6   : > { %v446_v56 = vpack.c.bf16 %v398_v51, %v384_v45  ;;  %v447_v57 = vpack.c.bf16 %v399_v52, %v385_v46 }
  0xb9   : > { %473 = vmatpush.bf16.msra.mxu0 %v446_v56  ;;  %486 = vmatpush.bf16.msra.mxu1 %v447_v57 }
  0xba   : > { %v366_v63 = vpop.permute.xlu1 %365  ;;  %v354_v2 = vpop.permute.xlu0 %353 }
  0xbb   : > { %v370_v3 = vsel %vm369_vm5, %v366_v63, %v368_v59  ;;  %v371_v4 = vsel %vm369_vm5, %v368_v59, %v366_v63  ;;  %v356_v5 = vsel %vm355_vm6, %v352_v35, %v354_v2  ;;  %v357_v7 = vsel %vm355_vm6, %v354_v2, %v352_v35 }
  0xbc   : > { %v377_v17 = vmul.f32 %v373_v58, %v371_v4  ;;  %v378_v18 = vmul.f32 %v374_v60, %v370_v3  ;;  %v363_v20 = vmul.f32 %v359_v61, %v357_v7  ;;  %v364_v21 = vmul.f32 %v360_v62, %v356_v5 }
  0xbd   : > { %v346_v35 = vperm.slane %v1322_v26, 1 }
  0xbe   : > { %v444_v22 = vpack.c.bf16 %v377_v17, %v363_v20  ;;  %v445_v23 = vpack.c.bf16 %v378_v18, %v364_v21 }
  0xc0   : > { %474 = vmatpush.bf16.msra.mxu0 %v444_v22  ;;  %487 = vmatpush.bf16.msra.mxu1 %v445_v23 }
  0xc2   : > { %v322_v24 = vpop.permute.xlu0 %321  ;;  %v324_v27 = vpop.permute.xlu1 %323 }
  0xc3   : > { %v328_v36 = vsel %vm327_vm7, %v322_v24, %v324_v27  ;;  %v329_v37 = vsel %vm327_vm7, %v324_v27, %v322_v24 }
  0xc4   : > { %v335_v43 = vmul.f32 %v331_v31, %v329_v37  ;;  %v336_v44 = vmul.f32 %v332_v32, %v328_v36 }
  0xca   : > { %v340_v38 = vpop.permute.xlu0 %339  ;;  %v455_v50 = vpop.permute.xlu1 %454 }
  0xcb   : > { %v342_v39 = vsel %vm341_vm8, %v338_v33, %v340_v38  ;;  %v343_v42 = vsel %vm341_vm8, %v340_v38, %v338_v33 }
  0xcc   : > { %v349_v45 = vmul.f32 %v345_v34, %v343_v42  ;;  %v350_v46 = vmul.f32 %v346_v35, %v342_v39 }
  0xce   : > { %v442_v47 = vpack.c.bf16 %v349_v45, %v335_v43  ;;  %v443_v48 = vpack.c.bf16 %v350_v46, %v336_v44 }
  0xd0   : > { %475 = vmatpush.bf16.msra.mxu0 %v442_v47  ;;  %488 = vmatpush.bf16.msra.mxu1 %v443_v48 }
  0xd3   : > { %755 = vmatmul.msk.bf16.vlgmr.msra.gmra.mxu0 %vm457_vm9, %v319_v49  ;;  %756 = vmatmul.msk.bf16.vlgmr.msra.gmra.mxu1 %vm457_vm9, %v319_v49 }
 0x150   : > { %v477_v51 = vpop.f32.mrf.mxu0  ;;  %v490_v52 = vpop.f32.mrf.mxu1 }
 0x151   : > { %v478_v54 = vadd.f32 %v477_v51, %v455_v50  ;;  %v491_v56 = vadd.f32 %v490_v52, %v455_v50 }
 0x153   : > { %vm494_vm10 = vcmp.gt.f32.partialorder %v478_v54, 0.0  ;;  %v496_v57 = vmul.f32 0.01, %v478_v54  ;;  %vm495_vm11 = vcmp.gt.f32.partialorder %v491_v56, 0.0  ;;  %v497_v59 = vmul.f32 0.01, %v491_v56 }
 0x155   : > { %v498_v63 = vsel %vm494_vm10, %v478_v54, %v496_v57  ;;  %v499_v2 = vsel %vm495_vm11, %v491_v56, %v497_v59 }
 0x156   : > { %562 = vrot.lane.b32.xlu0 %v499_v2, %s1009_s12  ;;  %544 = vrot.lane.b32.xlu1 %v498_v63, %s1008_s8 }
 0x157   : > { %560 = vrot.lane.b32.xlu2 %v498_v63, %s1009_s12 }
 0x158   : > { %v479_v3 = vpop.f32.mrf.mxu0  ;;  %v492_v4 = vpop.f32.mrf.mxu1 }
 0x15e   : > { %552 = vrot.lane.b32.xlu0 %v498_v63, %s1010_s13  ;;  %554 = vrot.lane.b32.xlu1 %v499_v2, %s1010_s13  ;;  %s765_s13 = sshll.u32 %s1073_s25, 4  ;;  %s629_s25 = scalar_lea.sflag [#allocation4], %s1148_s26 }
 0x15f   : > { %546 = vrot.lane.b32.xlu2 %v499_v2, %s1008_s8  ;;  %s954_s8 = scalar_lea.hbm %s1482_s6, 32 }
 0x166   : > { %538 = vrot.lane.b32.xlu0 %v499_v2, %s1011_s27  ;;  %518 = vrot.lane.b32.xlu1 %v498_v63, %s1012_s14 }
 0x167   : > { %536 = vrot.lane.b32.xlu2 %v498_v63, %s1011_s27 }
 0x16e   : > { %526 = vrot.lane.b32.xlu0 %v498_v63, %s1013_s15  ;;  %528 = vrot.lane.b32.xlu1 %v499_v2, %s1013_s15  ;;  %s640_s15 = scalar_lea.hbm %s1482_s6, %s765_s13 }
 0x16f   : > { %520 = vrot.lane.b32.xlu2 %v499_v2, %s1012_s14  ;;  %s644_s10 = sshll.u32 %s640_s15, 4  ;;  %s645_s10 = int_to_ptr.hbm [resolvable:$true] %s644_s10 }
 0x170   : > { %s948_s30 = sshra.s32 %s645_s10, 4  ;;  %s949_s30 = int_to_ptr.hbm [resolvable:$true] %s948_s30 }
 0x171   : > { %s950_s17 = scalar_lea.hbm %s949_s30, 16  ;;  %p955_p9 = scmp.lt.s32.totalorder %s949_s30, %s1482_s6 }
 0x172   : > { %p951_p1 = scmp.ne.s32.totalorder %s949_s30, %s950_s17  ;;  %p956_p2 = scmp.lt.s32.totalorder %s954_s8, %s950_s17 }
 0x174   : > { %p952_p4 = pnand %p951_p1, %p1118_p3  ;;  %p957_p10 = por %p956_p2, %p955_p9 }
 0x176   : > { %504 = vrot.lane.b32.xlu0 %v499_v2, %s1014_s18  ;;  %510 = vrot.lane.b32.xlu1 %v498_v63, %s1015_s29  ;;  %p953_p8 = pneg %p952_p4 }
 0x177   : > { %502 = vrot.lane.b32.xlu2 %v498_v63, %s1014_s18  ;;  %s1489_s18 = sshll.u32 %s1148_s26, 4 }
 0x178   : > { %p958_p11 = pnand %p957_p10, %p953_p8 }
 0x17f   : > { %512 = vrot.lane.b32.xlu2 %v499_v2, %s1015_s29  ;;  %s298_s29 = scalar_lea.vmem [#allocation8], %s1489_s18 }
 0x180   : > { %s642_s9 = sshll.u32 %s298_s29, 4  ;;  %s643_s9 = int_to_ptr.vmem [resolvable:$true] %s642_s9 }
 0x1b1   : > { %v561_v5 = vpop.permute.xlu2 %560 }
 0x1b9   : > { %v547_v7 = vpop.permute.xlu2 %546 }
 0x1c1   : > { %v537_v20 = vpop.permute.xlu2 %536 }
 0x1c8   : > { %v563_v17 = vpop.permute.xlu0 %562  ;;  %v545_v18 = vpop.permute.xlu1 %544 }
 0x1c9   : > { %v564_v21 = vsel %vm432_vm2, %v561_v5, %v563_v17  ;;  %v565_v22 = vsel %vm432_vm2, %v563_v17, %v561_v5  ;;  %v548_v38 = vsel %vm404_vm1, %v545_v18, %v547_v7  ;;  %v549_v39 = vsel %vm404_vm1, %v547_v7, %v545_v18  ;;  %v521_v48 = vpop.permute.xlu2 %520 }
 0x1ca   : > { %v566_v23 = vmul.f32 %v564_v21, %v436_v11  ;;  %v567_v24 = vmul.f32 %v565_v22, %v437_v12  ;;  %v501_v12 = vld [vmem:[%s1481_s5] sm:$0xff]  ;;  %v550_v44 = vmul.f32 %v548_v38, %v408_v15  ;;  %v551_v45 = vmul.f32 %v549_v39, %v409_v16 }
 0x1cb   : > { %580 = vperm.xlu0 %843, %v501_v12   ;;  %v535_v16 = vmul.f32 %v499_v2, %v381_v30 }
 0x1cc   : > { %v576_v27 = vpack.c.bf16 %v566_v23, %v566_v23  ;;  %v577_v33 = vpack.c.bf16 %v567_v24, %v567_v24  ;;  %v500_v24 = vld [vmem:[#allocation7] sm:$0xf] }
 0x1ce   : > { %v587_v36 = vsel %vm461_vm3, %v576_v27, 0  ;;  %v590_v37 = vsel %vm461_vm3, %v577_v33, 0 }
 0x1cf   : > { %595 = vmatpush.bf16.msra.mxu2 %v587_v36  ;;  %608 = vmatpush.bf16.msra.mxu3 %v590_v37 }
 0x1d0   : > { %v553_v42 = vpop.permute.xlu0 %552  ;;  %v555_v43 = vpop.permute.xlu1 %554 }
 0x1d1   : > { %v556_v8 = vsel %vm418_vm0, %v553_v42, %v555_v43  ;;  %v557_v11 = vsel %vm418_vm0, %v555_v43, %v553_v42  ;;  %v503_v57 = vpop.permute.xlu2 %502 }
 0x1d2   : > { %v558_v46 = vmul.f32 %v556_v8, %v422_v13  ;;  %v559_v47 = vmul.f32 %v557_v11, %v423_v14  ;;  %v534_v14 = vmul.f32 %v498_v63, %v380_v29 }
 0x1d4   : > { %v574_v49 = vpack.c.bf16 %v558_v46, %v550_v44  ;;  %v575_v50 = vpack.c.bf16 %v559_v47, %v551_v45 }
 0x1d6   : > { %596 = vmatpush.bf16.msra.mxu2 %v574_v49  ;;  %609 = vmatpush.bf16.msra.mxu3 %v575_v50 }
 0x1d8   : > { %v539_v51 = vpop.permute.xlu0 %538  ;;  %v519_v52 = vpop.permute.xlu1 %518 }
 0x1d9   : > { %v540_v15 = vsel %vm390_vm4, %v537_v20, %v539_v51  ;;  %v541_v10 = vsel %vm390_vm4, %v539_v51, %v537_v20  ;;  %v522_v59 = vsel %vm355_vm6, %v519_v52, %v521_v48  ;;  %v513_v7 = vpop.permute.xlu2 %512 }
 0x1da   : > { %v542_v13 = vmul.f32 %v540_v15, %v394_v40  ;;  %v543_v9 = vmul.f32 %v541_v10, %v395_v41  ;;  %v523_v40 = vsel %vm355_vm6, %v521_v48, %v519_v52  ;;  %v525_v30 = vmul.f32 %v522_v59, %v360_v62 }
 0x1db   : > { %v524_v29 = vmul.f32 %v523_v40, %v359_v61 }
 0x1dc   : > { %v572_v54 = vpack.c.bf16 %v542_v13, %v534_v14  ;;  %v573_v56 = vpack.c.bf16 %v543_v9, %v535_v16 }
 0x1de   : > { %597 = vmatpush.bf16.msra.mxu2 %v572_v54  ;;  %610 = vmatpush.bf16.msra.mxu3 %v573_v56 }
 0x1e0   : > { %v527_v3 = vpop.permute.xlu0 %526  ;;  %v529_v28 = vpop.permute.xlu1 %528 }
 0x1e1   : > { %v530_v41 = vsel %vm369_vm5, %v527_v3, %v529_v28  ;;  %v531_v19 = vsel %vm369_vm5, %v529_v28, %v527_v3 }
 0x1e2   : > { %v532_v63 = vmul.f32 %v531_v19, %v373_v58  ;;  %v533_v2 = vmul.f32 %v530_v41, %v374_v60 }
 0x1e4   : > { %v570_v4 = vpack.c.bf16 %v532_v63, %v524_v29  ;;  %v571_v5 = vpack.c.bf16 %v533_v2, %v525_v30 }
 0x1e6   : > { %598 = vmatpush.bf16.msra.mxu2 %v570_v4  ;;  %611 = vmatpush.bf16.msra.mxu3 %v571_v5 }
 0x1e8   : > { %v505_v17 = vpop.permute.xlu0 %504  ;;  %v511_v18 = vpop.permute.xlu1 %510 }
 0x1e9   : > { %v506_v20 = vsel %vm327_vm7, %v503_v57, %v505_v17  ;;  %v507_v55 = vsel %vm327_vm7, %v505_v17, %v503_v57  ;;  %v514_v58 = vsel %vm341_vm8, %v511_v18, %v513_v7  ;;  %v515_v53 = vsel %vm341_vm8, %v513_v7, %v511_v18 }
 0x1ea   : > { %v508_v60 = vmul.f32 %v507_v55, %v331_v31  ;;  %v509_v61 = vmul.f32 %v506_v20, %v332_v32  ;;  %v516_v62 = vmul.f32 %v515_v53, %v345_v34  ;;  %v517_v21 = vmul.f32 %v514_v58, %v346_v35 }
 0x1ec   : > { %v568_v22 = vpack.c.bf16 %v516_v62, %v508_v60  ;;  %v569_v23 = vpack.c.bf16 %v517_v21, %v509_v61 }
 0x1ee   : > { %599 = vmatpush.bf16.msra.mxu2 %v568_v22  ;;  %612 = vmatpush.bf16.msra.mxu3 %v569_v23 }
 0x1f1   : > { %757 = vmatmul.msk.bf16.vlgmr.msra.gmra.mxu2 %vm457_vm9, %v500_v24  ;;  %758 = vmatmul.msk.bf16.vlgmr.msra.gmra.mxu3 %vm457_vm9, %v500_v24 }
 0x23d   : > { %v581_v6 = vpop.permute.xlu0 %580 }
 0x274   : > { %v601_v25 = vpop.f32.mrf.mxu2  ;;  %v614_v31 = vpop.f32.mrf.mxu3 }
 0x275   : > { %v602_v32 = vadd.f32 %v601_v25, %v581_v6  ;;  %v615_v27 = vadd.f32 %v614_v31, %v581_v6 }
 0x277   : > { %vm618_vm12 = vcmp.gt.f32.partialorder %v602_v32, 0.0  ;;  %v620_v26 = vmul.f32 0.01, %v602_v32  ;;  %vm619_vm13 = vcmp.gt.f32.partialorder %v615_v27, 0.0  ;;  %v621_v34 = vmul.f32 0.01, %v615_v27 }
 0x279   : > { %v622_v35 = vsel %vm618_vm12, %v602_v32, %v620_v26  ;;  %v623_v33 = vsel %vm619_vm13, %v615_v27, %v621_v34 }
 0x27a   : > { %v624_v36 = vadd.f32 %v622_v35, %v1162_v0  ;;  %v625_v37 = vadd.f32 %v623_v33, %v1170_v1 }
 0x27c   : > { %v603_v38 = vpop.f32.mrf.mxu2  ;;  %v616_v39 = vpop.f32.mrf.mxu3  ;;  %626 = vst [vmem:[%s298_s29] sm:$0xff] %v624_v36 }
 0x27d   : > { %627 = vst [vmem:[%s298_s29 + $0x8] sm:$0xff] %v625_v37 }
 0x27e   : > { %961 = shalt.err (!%p958_p11)
}
 0x27f   : > { %776 = dma.vmem_to_hbm [thread:$0]  (%p1118_p3), %s643_s9, 256, %s645_s10, %s629_s25  }
 0x280 PF: > { %s656_s26 = sand.u32 1, %s992_s21   ;;  %p1490_p12 = scmp.ge.s32.totalorder %s1004_s24, 2 }
 0x281   : > { %s657_s27 = scalar_lea.sflag [#allocation4], %s656_s26 }
 0x282   : > { %p790_p13 = pnand %p1490_p12, %p1087_p6 }
 0x284   : > { %p791_p0 = pneg %p790_p13 }
 0x286   : > { %987 = dma.done.wait (%p791_p0), %s657_s27, 256  }
 0x287   : > { %989 = vsyncadd (%p791_p0), %s657_s27, 4294967040  ;;  %p20_p5 = scmp.ge.s32.totalorder %s1108_s16, 4   ;;  %s1491_s21 = smov %s996_s22 }
 0x288   : > { %s1492_s22 = smov %s1000_s23  ;;  %s1493_s23 = smov %s1124_s20 }
 0x289   : > { %s1494_s24 = smov %s1108_s16  ;;  %22 = sbr.rel (!%p20_p5) target bundleno = 6 (0x6), region = 105 }
 0x28e   :  { %663 = vsyncpa [#allocation3], 1 }
 0x28f   :  { %665 = vsyncpa [#allocation3 + $0x1], 1 }
 0x290   :  { %666 = vsyncpa [#allocation6], 1 }
 0x291   :  { %667 = vsyncpa [#allocation4], 1 }
 0x292   :  { %669 = vsyncpa [#allocation4 + $0x1], 1 }

</bundles_post_ra>
